<compile_context>
chip_gen: v5e
topology: v5e:2x2
jax: 0.10.0
libtpu: 0.0.40
codegen_flags: <defaults>
</compile_context>

<pallas_src>
import functools

import jax
import jax.numpy as jnp
from jax import lax
from jax.experimental import pallas as pl
from jax.experimental.pallas import tpu as pltpu


_LANE = 128
_SUBLANE = 8
# Conservative budget for the pipelined tiles: well under v7x's 64 MiB/TC VMEM.
_TILE_VMEM_BUDGET = 40 * 1024 * 1024


def _round_up(x, m):
    return ((x + m - 1) // m) * m


def _linear_kernel(x_ref, w_ref, b_ref, o_ref):
    # x_ref: (tile_b, in_dim)          VMEM
    # w_ref: (tile_n, in_dim)          VMEM
    # b_ref: (1, tile_n) float32       VMEM
    # o_ref: (tile_b, tile_n)          VMEM
    # Contract x's dim 1 with w's dim 1 (== x @ w.T) directly on the MXU; the
    # weight is never transposed/copied in HBM.
    acc = lax.dot_general(
        x_ref[...], w_ref[...],
        dimension_numbers=(((1,), (1,)), ((), ())),
        preferred_element_type=jnp.float32,
    )
    o_ref[...] = (acc + b_ref[...]).astype(o_ref.dtype)


def _vmem_bytes(tile_b, tile_n, in_dim, in_itemsize, out_itemsize):
    # The BlockSpec pipeline double-buffers every operand.
    w_bytes = tile_n * in_dim * in_itemsize
    b_bytes = tile_n * 4
    x_bytes = tile_b * in_dim * in_itemsize
    o_bytes = tile_b * tile_n * out_itemsize
    return 2 * (w_bytes + b_bytes + x_bytes + o_bytes)


def _pick_tiles(B, in_dim, out_pad, in_itemsize, out_itemsize):
    # Class-axis tile: lane-dense multiple of 128, capped at 512.
    tile_n = min(out_pad, 512)
    # Batch-axis tile: default to a real tile (<=512 rows) so large batches get
    # grid > 1 (DMA/compute overlap + v7x dual-TC split); shrink tiles if the
    # double-buffered working set would blow the VMEM budget.
    tile_b = min(512, _round_up(B, _SUBLANE))
    while (_vmem_bytes(tile_b, tile_n, in_dim, in_itemsize, out_itemsize)
           > _TILE_VMEM_BUDGET):
        if tile_b > _SUBLANE:
            tile_b = max(_SUBLANE, _round_up(tile_b // 2, _SUBLANE))
        elif tile_n > _LANE:
            tile_n = max(_LANE, _round_up(tile_n // 2, _LANE))
        else:
            break
    return tile_b, tile_n


@functools.partial(jax.jit, static_argnames=("tile_b", "tile_n", "use_bf16"))
def svm_forward(x, weight, bias, *, tile_b=None, tile_n=None, use_bf16=False):
    """y = x @ weight.T + bias via a Pallas TPU kernel.

    Args:
      x:      (B, input_dim)
      weight: (output_dim, input_dim)   (PyTorch nn.Linear convention)
      bias:   (output_dim,)
      tile_b: optional rows-per-grid-step (multiple of 8).
      tile_n: optional classes-per-grid-step (multiple of 128).
      use_bf16: cast x/weight to bf16 for the MXU (f32 accumulation); halves
        HBM traffic on v6e/v7x when accuracy allows.
    Returns:
      (B, output_dim) array with x's dtype.
    """
    B, in_dim = x.shape
    out_dim, in_dim_w = weight.shape
    assert in_dim == in_dim_w
    out_dtype = x.dtype

    # Pad the class axis to a lane-dense multiple of 128 so output stores are
    # unmasked full vst; the pad is sliced off after the call.
    out_pad = _round_up(out_dim, _LANE)
    if out_pad != out_dim:
        weight = jnp.pad(weight, ((0, out_pad - out_dim), (0, 0)))
        bias = jnp.pad(bias, (0, out_pad - out_dim))
    b2d = bias.astype(jnp.float32).reshape(1, out_pad)

    if use_bf16:
        x_in = x.astype(jnp.bfloat16)
        w_in = weight.astype(jnp.bfloat16)
    else:
        x_in = x
        w_in = weight

    in_itemsize = jnp.dtype(x_in.dtype).itemsize
    out_itemsize = jnp.dtype(out_dtype).itemsize

    auto_b, auto_n = _pick_tiles(B, in_dim, out_pad, in_itemsize, out_itemsize)
    if tile_b is None:
        tile_b = auto_b
    if tile_n is None:
        tile_n = auto_n

    if tile_b >= B:
        tile_b = B                              # full-extent block: always legal
    else:
        tile_b = max(_SUBLANE, (tile_b // _SUBLANE) * _SUBLANE)
    if tile_n >= out_pad:
        tile_n = out_pad
    else:
        tile_n = max(_LANE, (tile_n // _LANE) * _LANE)

    grid = (pl.cdiv(B, tile_b), pl.cdiv(out_pad, tile_n))

    vmem_est = _vmem_bytes(tile_b, tile_n, in_dim, in_itemsize, out_itemsize)
    vmem_limit = int(min(max(2 * vmem_est, 32 * 1024 * 1024),
                         56 * 1024 * 1024))

    cost = pl.CostEstimate(
        flops=2 * B * in_dim * out_pad,
        transcendentals=0,
        bytes_accessed=(B * in_dim * in_itemsize
                        + out_pad * in_dim * in_itemsize
                        + out_pad * 4
                        + B * out_pad * out_itemsize),
    )

    y_pad = pl.pallas_call(
        _linear_kernel,
        out_shape=jax.ShapeDtypeStruct((B, out_pad), out_dtype),
        grid_spec=pltpu.PrefetchScalarGridSpec(
            num_scalar_prefetch=0,
            grid=grid,
            in_specs=[
                pl.BlockSpec((tile_b, in_dim), lambda i, j: (i, 0)),
                pl.BlockSpec((tile_n, in_dim), lambda i, j: (j, 0)),
                pl.BlockSpec((1, tile_n), lambda i, j: (0, j)),
            ],
            out_specs=pl.BlockSpec((tile_b, tile_n), lambda i, j: (i, j)),
        ),
        compiler_params=pltpu.CompilerParams(
            dimension_semantics=("parallel", "parallel"),
            vmem_limit_bytes=vmem_limit,
        ),
        cost_estimate=cost,
    )(x_in, w_in, b2d)

    if out_pad != out_dim:
        y_pad = y_pad[:, :out_dim]
    return y_pad


if __name__ == "__main__":
    # Small, deterministic setup consistent with SVM(input_dim, output_dim).
    batch = 8
    input_dim = 32
    output_dim = 16

    key = jax.random.PRNGKey(0)
    kx, kw, kb = jax.random.split(key, 3)

    # Deterministic param init mimicking nn.Linear's U(-1/sqrt(in), 1/sqrt(in)).
    bound = 1.0 / (input_dim ** 0.5)
    weight = jax.random.uniform(kw, (output_dim, input_dim),
                                minval=-bound, maxval=bound, dtype=jnp.float32)
    bias = jax.random.uniform(kb, (output_dim,),
                              minval=-bound, maxval=bound, dtype=jnp.float32)
    x = jax.random.normal(kx, (batch, input_dim), dtype=jnp.float32)

    y = jax.block_until_ready(svm_forward(x, weight, bias))
    y_ref = x @ weight.T + bias
    assert y.shape == (batch, output_dim)
    assert jnp.allclose(y, y_ref, atol=1e-5, rtol=1e-5)

    # Second check: multi-step "parallel" batch grid, lane padding, ragged tile.
    b2, in2, out2 = 200, 96, 24
    k2x, k2w, k2b = jax.random.split(jax.random.PRNGKey(0), 3)
    w2 = jax.random.normal(k2w, (out2, in2), dtype=jnp.float32) * 0.1
    bb2 = jax.random.normal(k2b, (out2,), dtype=jnp.float32) * 0.1
    x2 = jax.random.normal(k2x, (b2, in2), dtype=jnp.float32)
    y2 = jax.block_until_ready(svm_forward(x2, w2, bb2, tile_b=128))
    y2_ref = x2 @ w2.T + bb2
    assert y2.shape == (b2, out2)
    assert jnp.allclose(y2, y2_ref, atol=1e-3, rtol=1e-3)

    # Third check: 2-D grid (batch tiles x class tiles) with ragged batch tile
    # and padded class axis.
    b3, in3, out3 = 96, 64, 272
    k3x, k3w, k3b = jax.random.split(jax.random.PRNGKey(0), 3)
    w3 = jax.random.normal(k3w, (out3, in3), dtype=jnp.float32) * 0.1
    bb3 = jax.random.normal(k3b, (out3,), dtype=jnp.float32) * 0.1
    x3 = jax.random.normal(k3x, (b3, in3), dtype=jnp.float32)
    y3 = jax.block_until_ready(svm_forward(x3, w3, bb3, tile_b=64, tile_n=128))
    y3_ref = x3 @ w3.T + bb3
    assert y3.shape == (b3, out3)
    assert jnp.allclose(y3, y3_ref, atol=1e-3, rtol=1e-3)

    print("KERNEL_OK")
</pallas_src>

<mosaic_0001>
module attributes {stable_mosaic.version = 11 : i64} {
  func.func @_linear_kernel(%arg0: i32, %arg1: i32, %arg2: memref<8x32xf32, #tpu.memory_space<vmem>>, %arg3: memref<128x32xf32, #tpu.memory_space<vmem>>, %arg4: memref<1x128xf32, #tpu.memory_space<vmem>>, %arg5: memref<8x128xf32, #tpu.memory_space<vmem>>) attributes {dimension_semantics = [#tpu.dimension_semantics<parallel>, #tpu.dimension_semantics<parallel>], iteration_bounds = array<i64: 1, 1>, scalar_prefetch = 0 : i64, scratch_operands = 0 : i64, tpu.core_type = #tpu.core_type<tc>, window_params = [{transform_indices = @transform_0, window_bounds = array<i64: 8, 32>}, {transform_indices = @transform_1, window_bounds = array<i64: 128, 32>}, {transform_indices = @transform_2, window_bounds = array<i64: 1, 128>}, {transform_indices = @transform_3, window_bounds = array<i64: 8, 128>}]} {
    %c0 = arith.constant 0 : index
    %c0_0 = arith.constant 0 : index
    %0 = vector.load %arg2[%c0, %c0_0] : memref<8x32xf32, #tpu.memory_space<vmem>>, vector<8x32xf32>
    %c0_1 = arith.constant 0 : index
    %c0_2 = arith.constant 0 : index
    %1 = vector.load %arg3[%c0_1, %c0_2] : memref<128x32xf32, #tpu.memory_space<vmem>>, vector<128x32xf32>
    %cst = arith.constant dense<0.000000e+00> : vector<8x128xf32>
    %2 = tpu.matmul %0, %1, %cst {dimension_numbers = #tpu.dot_dimension_numbers<[1], [1], [0], [0], [0, 0, 1, 0], [], []>} : vector<8x32xf32>, vector<128x32xf32>, vector<8x128xf32> -> vector<8x128xf32>
    %c0_3 = arith.constant 0 : index
    %c0_4 = arith.constant 0 : index
    %3 = vector.load %arg4[%c0_3, %c0_4] : memref<1x128xf32, #tpu.memory_space<vmem>>, vector<1x128xf32>
    %4 = vector.broadcast %3 : vector<1x128xf32> to vector<8x128xf32>
    %5 = arith.addf %2, %4 : vector<8x128xf32>
    %c0_5 = arith.constant 0 : index
    %c0_6 = arith.constant 0 : index
    %6 = vector.load %arg5[%c0_5, %c0_6] : memref<8x128xf32, #tpu.memory_space<vmem>>, vector<8x128xf32>
    tpu.vector_store %arg5[%c0_5, %c0_6], %5 {strides = array<i32>} : memref<8x128xf32, #tpu.memory_space<vmem>>, vector<8x128xf32>,
    return
  }
  func.func @transform_0(%arg0: i32, %arg1: i32) -> (i32, i32) {
    %c0_i32 = arith.constant 0 : i32
    %c0_i32_0 = arith.constant 0 : i32
    return %arg0, %c0_i32 : i32, i32
  }
  func.func @transform_1(%arg0: i32, %arg1: i32) -> (i32, i32) {
    %c0_i32 = arith.constant 0 : i32
    %c0_i32_0 = arith.constant 0 : i32
    return %arg1, %c0_i32 : i32, i32
  }
  func.func @transform_2(%arg0: i32, %arg1: i32) -> (i32, i32) {
    %c0_i32 = arith.constant 0 : i32
    %c0_i32_0 = arith.constant 0 : i32
    return %c0_i32, %arg1 : i32, i32
  }
  func.func @transform_3(%arg0: i32, %arg1: i32) -> (i32, i32) {
    %c0_i32 = arith.constant 0 : i32
    return %arg0, %arg1 : i32, i32
  }
}

</mosaic_0001>

<bundles_post_ra>
// kernel: svm_forward.1
= control target key start
LH: loop header
LB: loop body
LE: loop exit
PB: predicated region body
PF: predicated region fallthrough
CT: control target
= control target key end

     0   :  { %vm36_vm0 = vcmask 261120   ;;  %s265_s0 = inlined_call_operand.vmem [shape: f32[8,32], index: 0, kind: input, shape index: {}]   ;;  %s266_s1 = inlined_call_operand.vmem [shape: f32[128,32], index: 1, kind: input, shape index: {}]   ;;  %s267_s2 = inlined_call_operand.vmem [shape: f32[1,128], index: 2, kind: input, shape index: {}]   ;;  %s268_s3 = inlined_call_operand.hbm [shape: f32[8,128], index: 3, kind: output, shape index: {}]  }
   0x1   :  { %v31_v0 = vld [vmem:[%s266_s1 + $0x78] sm:$0xff]  ;;  %v30_v1 = vld [vmem:[%s266_s1 + $0x70] sm:$0xff] }
   0x2   :  { %125 = vmatpush.xpose.msk.msra.mxu0 %vm36_vm0, %v31_v0 }
   0x3   :  { %8 = vsyncpa [#allocation3], 0  ;;  %v29_v2 = vld [vmem:[%s266_s1 + $0x68] sm:$0xff]  ;;  %v28_v3 = vld [vmem:[%s266_s1 + $0x60] sm:$0xff]  ;;  %s170_s21 = smov [#allocation2]   ;;  %s116_s25 = sshll.u32 %s268_s3, 4  ;;  %s117_s25 = int_to_ptr.hbm [resolvable:$true] %s116_s25 }
   0x4   :  { %v27_v4 = vld [vmem:[%s266_s1 + $0x58] sm:$0xff]  ;;  %v26_v5 = vld [vmem:[%s266_s1 + $0x50] sm:$0xff]  ;;  %v25_v6 = vld [vmem:[%s266_s1 + $0x48] sm:$0xff]  ;;  %s114_s22 = sshll.u32 %s170_s21, 4  ;;  %s115_s22 = int_to_ptr.vmem [resolvable:$true] %s114_s22 }
   0x5   :  { %v24_v7 = vld [vmem:[%s266_s1 + $0x40] sm:$0xff]  ;;  %v23_v8 = vld [vmem:[%s266_s1 + $0x38] sm:$0xff]  ;;  %v22_v9 = vld [vmem:[%s266_s1 + $0x30] sm:$0xff] }
   0x6   :  { %126 = vmatpush.xpose.msk.msra.mxu0 %vm36_vm0, %v30_v1  ;;  %v21_v10 = vld [vmem:[%s266_s1 + $0x28] sm:$0xff]  ;;  %v20_v11 = vld [vmem:[%s266_s1 + $0x20] sm:$0xff]  ;;  %v19_v12 = vld [vmem:[%s266_s1 + $0x18] sm:$0xff] }
   0x7   :  { %v18_v13 = vld [vmem:[%s266_s1 + $0x10] sm:$0xff]  ;;  %v17_v14 = vld [vmem:[%s266_s1 + $0x8] sm:$0xff]  ;;  %v16_v15 = vld [vmem:[%s266_s1] sm:$0xff] }
   0x8   :  { %v15_v16 = vld [vmem:[%s265_s0] sm:$0xff] }
   0x9   :  { %v143_v17 = vld [vmem:[%s267_s2] ss:$0 sm:$0xff] }
   0xa   :  { %127 = vmatpush.xpose.msk.msra.mxu0 %vm36_vm0, %v29_v2 }
   0xe   :  { %128 = vmatpush.xpose.msk.msra.mxu0 %vm36_vm0, %v28_v3 }
  0x12   :  { %129 = vmatpush.xpose.msk.msra.mxu0 %vm36_vm0, %v27_v4 }
  0x16   :  { %130 = vmatpush.xpose.msk.msra.mxu0 %vm36_vm0, %v26_v5 }
  0x1a   :  { %131 = vmatpush.xpose.msk.msra.mxu0 %vm36_vm0, %v25_v6 }
  0x1e   :  { %132 = vmatpush.xpose.msk.msra.mxu0 %vm36_vm0, %v24_v7 }
  0x22   :  { %133 = vmatpush.xpose.msk.msra.mxu0 %vm36_vm0, %v23_v8 }
  0x26   :  { %134 = vmatpush.xpose.msk.msra.mxu0 %vm36_vm0, %v22_v9 }
  0x2a   :  { %135 = vmatpush.xpose.msk.msra.mxu0 %vm36_vm0, %v21_v10 }
  0x2e   :  { %136 = vmatpush.xpose.msk.msra.mxu0 %vm36_vm0, %v20_v11 }
  0x32   :  { %137 = vmatpush.xpose.msk.msra.mxu0 %vm36_vm0, %v19_v12 }
  0x36   :  { %138 = vmatpush.xpose.msk.msra.mxu0 %vm36_vm0, %v18_v13 }
  0x3a   :  { %139 = vmatpush.xpose.msk.msra.mxu0 %vm36_vm0, %v17_v14 }
  0x3e   :  { %140 = vmatpush.xpose.msk.msra.mxu0 %vm36_vm0, %v16_v15 }
  0x41   :  { %141 = vmatmul.msk.f32.vlgmr.msra.gmra.mxu0 %vm36_vm0, %v15_v16 }
  0xbe   :  { %v105_v18 = vpop.f32.mrf.mxu0 }
  0xbf   :  { %v106_v19 = vadd.f32 %v143_v17, %v105_v18 }
  0xc1   :  { %108 = vst [vmem:[#allocation2] sm:$0xff] %v106_v19 }
  0xc2   :  { %119 = dma.vmem_to_hbm [thread:$0]  %s115_s22, 128, %s117_s25, [#allocation3]  }
  0xc3   :  { %168 = dma.done.wait [#allocation3], 128  }
  0xc4   :  { %169 = vsyncadd [#allocation3], 4294967168 }
  0xc5   :  { %124 = vsyncpa [#allocation3], 1 }

</bundles_post_ra>
